<compile_context>
chip_gen: v7x
topology: tpu7x:2x2x1
jax: 0.10.0
libtpu: 0.0.40
codegen_flags: <defaults>
</compile_context>

<pallas_src>
import jax
import jax.numpy as jnp
import numpy as np
from jax.experimental import pallas as pl
from jax.experimental.pallas import tpu as pltpu

IN_DIMS = [16, 32, 64]
EMBED_DIM = 128            # small embed_dim, lane-aligned (module default is 768)
BASE = IN_DIMS[0]
EPS = 1e-5

# (input index into xs, stride, padding, dilation, Cin)  -- mirrors __init__:
#   i=0 (xs[2]): Conv(64,16,3, s=2, p=1, d=1)
#   i=1 (xs[1]): Conv(32,16,3, s=4, p=1+j, d=1+j)  j=0,1
#   i=2 (xs[0]): Conv(16,16,3, s=8, p=1+j, d=1+j)  j=0..3
CONV_SPECS = [
    (2, 2, 1, 1, 64),
    (1, 4, 1, 1, 32),
    (1, 4, 2, 2, 32),
    (0, 8, 1, 1, 16),
    (0, 8, 2, 2, 16),
    (0, 8, 3, 3, 16),
    (0, 8, 4, 4, 16),
]

K_TOT = sum(cin * 9 for (_, _, _, _, cin) in CONV_SPECS)      # 1728
K_PAD = ((K_TOT + 127) // 128) * 128                          # 1792 (MXU-aligned)


def im2col(x, stride, pad, dil):
    """x: (B, C, H, W) -> (B*Ho*Wo, C*9) with feature order (c, ki, kj)."""
    B, C, H, W = x.shape
    Ho = (H + 2 * pad - 2 * dil - 1) // stride + 1
    Wo = (W + 2 * pad - 2 * dil - 1) // stride + 1
    xp = jnp.pad(x, ((0, 0), (0, 0), (pad, pad), (pad, pad)))
    cols = []
    for ki in range(3):
        for kj in range(3):
            h0, w0 = ki * dil, kj * dil
            sl = xp[:, :, h0:h0 + (Ho - 1) * stride + 1:stride,
                          w0:w0 + (Wo - 1) * stride + 1:stride]
            cols.append(sl)                       # (B, C, Ho, Wo)
    cols = jnp.stack(cols, axis=2)                # (B, C, 9, Ho, Wo)
    cols = cols.transpose(0, 3, 4, 1, 2)          # (B, Ho, Wo, C, 9)
    return cols.reshape(B * Ho * Wo, C * 9), Ho, Wo


def csp_kernel(p_ref, w_ref, b_ref, gamma_ref, beta_ref, o_ref):
    # single fused GEMM == all 7 convs + channel-cat + 1x1 projection
    x = jnp.dot(p_ref[...], w_ref[...],
                preferred_element_type=jnp.float32) + b_ref[...]
    # LayerNorm over embed dim (biased variance, eps=1e-5, like nn.LayerNorm)
    mu = jnp.mean(x, axis=-1, keepdims=True)
    var = jnp.mean(jnp.square(x - mu), axis=-1, keepdims=True)
    xn = (x - mu) * jax.lax.rsqrt(var + EPS)
    o_ref[...] = (xn * gamma_ref[...] + beta_ref[...]).astype(o_ref.dtype)


def fold_params(params):
    """Fold conv weights + 1x1 proj into one dense (K_PAD, E) GEMM weight and
    bias.  Run ONCE per parameter set, outside the per-call traced path."""
    wproj_m = params["wproj"].reshape(EMBED_DIM, BASE * len(CONV_SPECS)).T  # (112,E)
    blocks = []
    for k, ((_, _, _, _, cin), w) in enumerate(zip(CONV_SPECS,
                                                   params["conv_ws"])):
        wk = w.reshape(BASE, cin * 9).T                         # (cin*9, 16)
        blocks.append(wk @ wproj_m[k * BASE:(k + 1) * BASE, :])  # (cin*9, E)
    w_eff = jnp.concatenate(blocks, axis=0)                     # (K_TOT, E)
    w_eff = jnp.pad(w_eff, ((0, K_PAD - K_TOT), (0, 0)))        # (K_PAD, E)
    bcat = jnp.concatenate(params["conv_bs"])[None, :]          # (1, 112)
    b_eff = bcat @ wproj_m + params["bproj"][None, :]           # (1, E)
    return dict(w_eff=w_eff.astype(jnp.bfloat16),
                b_eff=b_eff.astype(jnp.float32),
                gamma=params["gamma"][None, :].astype(jnp.float32),
                beta=params["beta"][None, :].astype(jnp.float32))


def cross_scale_patch_embed(xs, folded, *, tm=512):
    # TODO(synk): fuse the im2col into the kernel (stream NHWC input tiles and
    # accumulate the 9 shifted (TM,Cin)x(Cin,E) dots per conv) to remove the
    # HBM round trip of P; currently XLA materializes P before the kernel.
    P_list, Ho, Wo = [], None, None
    for (xi, s, p, d, cin) in CONV_SPECS:
        pk, Ho, Wo = im2col(xs[xi], s, p, d)
        P_list.append(pk)
    P = jnp.concatenate(P_list, axis=1)                         # (N, K_TOT)
    N = P.shape[0]
    B = xs[0].shape[0]

    # token tile: multiple of 8, capped at tm; pad tokens so the last tile is
    # full (zero rows are harmless through the GEMM + row-wise LayerNorm and
    # are stripped below).
    TM = min(tm, ((N + 7) // 8) * 8)
    N_pad = ((N + TM - 1) // TM) * TM
    P = jnp.pad(P, ((0, N_pad - N), (0, K_PAD - K_TOT))).astype(jnp.bfloat16)

    out = pl.pallas_call(
        csp_kernel,
        out_shape=jax.ShapeDtypeStruct((N_pad, EMBED_DIM), jnp.float32),
        grid_spec=pltpu.PrefetchScalarGridSpec(
            num_scalar_prefetch=0,
            grid=(N_pad // TM,),
            in_specs=[
                pl.BlockSpec((TM, K_PAD), lambda i: (i, 0)),        # streamed
                pl.BlockSpec((K_PAD, EMBED_DIM), lambda i: (0, 0)),  # resident
                pl.BlockSpec((1, EMBED_DIM), lambda i: (0, 0)),
                pl.BlockSpec((1, EMBED_DIM), lambda i: (0, 0)),
                pl.BlockSpec((1, EMBED_DIM), lambda i: (0, 0)),
            ],
            out_specs=pl.BlockSpec((TM, EMBED_DIM), lambda i: (i, 0)),
        ),
        compiler_params=pltpu.CompilerParams(
            dimension_semantics=("parallel",)),
    )(P, folded["w_eff"], folded["b_eff"], folded["gamma"], folded["beta"])

    x = out[:N].reshape(B, Ho * Wo, EMBED_DIM)                  # (B, L, C)
    return x, Ho, Wo


def init_params(key):
    """Deterministic init matching the module's _init_weights."""
    keys = jax.random.split(key, len(CONV_SPECS) + 1)
    conv_ws, conv_bs = [], []
    std = (2.0 / (3 * 3 * BASE)) ** 0.5          # fan_out = kh*kw*out_ch
    for k, (xi, s, p, d, cin) in enumerate(CONV_SPECS):
        conv_ws.append(std * jax.random.normal(keys[k], (BASE, cin, 3, 3),
                                               jnp.float32))
        conv_bs.append(jnp.zeros((BASE,), jnp.float32))
    proj_std = (2.0 / (1 * 1 * EMBED_DIM)) ** 0.5
    wproj = proj_std * jax.random.normal(
        keys[-1], (EMBED_DIM, BASE * len(CONV_SPECS), 1, 1), jnp.float32)
    return dict(conv_ws=conv_ws, conv_bs=conv_bs, wproj=wproj,
                bproj=jnp.zeros((EMBED_DIM,), jnp.float32),
                gamma=jnp.ones((EMBED_DIM,), jnp.float32),
                beta=jnp.zeros((EMBED_DIM,), jnp.float32))


def ref_forward(xs, params):
    """Pure-JAX reference of the PyTorch forward (for correctness check)."""
    ys = []
    for (xi, s, p, d, cin), w, b in zip(CONV_SPECS, params["conv_ws"],
                                        params["conv_bs"]):
        y = jax.lax.conv_general_dilated(
            xs[xi], w, window_strides=(s, s), padding=[(p, p), (p, p)],
            rhs_dilation=(d, d), dimension_numbers=("NCHW", "OIHW", "NCHW"))
        ys.append(y + b[None, :, None, None])
    cat = jnp.concatenate(ys, axis=1)
    wproj = params["wproj"].reshape(EMBED_DIM, -1)
    x = jnp.einsum("bchw,ec->behw", cat, wproj) + \
        params["bproj"][None, :, None, None]
    B, E, H, W = x.shape
    x = x.reshape(B, E, H * W).transpose(0, 2, 1)
    mu = jnp.mean(x, axis=-1, keepdims=True)
    var = jnp.mean(jnp.square(x - mu), axis=-1, keepdims=True)
    xn = (x - mu) / jnp.sqrt(var + EPS)
    return xn * params["gamma"] + params["beta"], H, W


if __name__ == "__main__":
    key = jax.random.PRNGKey(0)
    kx0, kx1, kx2, kp = jax.random.split(key, 4)
    B, H0, W0 = 2, 16, 16
    xs = [
        jax.random.normal(kx0, (B, IN_DIMS[0], H0, W0), jnp.float32),
        jax.random.normal(kx1, (B, IN_DIMS[1], H0 // 2, W0 // 2), jnp.float32),
        jax.random.normal(kx2, (B, IN_DIMS[2], H0 // 4, W0 // 4), jnp.float32),
    ]
    params = init_params(kp)
    folded = fold_params(params)          # one-time weight fold (not per-call)

    out, H, W = cross_scale_patch_embed(xs, folded)
    out = jax.block_until_ready(out)

    ref, Hr, Wr = ref_forward(xs, params)
    assert (H, W) == (Hr, Wr), (H, W, Hr, Wr)
    # bf16 inputs with f32 accumulation over a 1728-deep contraction
    np.testing.assert_allclose(np.asarray(out), np.asarray(ref),
                               atol=2e-2, rtol=2e-2)
    print("KERNEL_OK")
</pallas_src>

<mosaic_0001>
module attributes {stable_mosaic.version = 11 : i64} {
  func.func @csp_kernel(%arg0: i32, %arg1: memref<8x1792xbf16, #tpu.memory_space<vmem>>, %arg2: memref<1792x128xbf16, #tpu.memory_space<vmem>>, %arg3: memref<1x128xf32, #tpu.memory_space<vmem>>, %arg4: memref<1x128xf32, #tpu.memory_space<vmem>>, %arg5: memref<1x128xf32, #tpu.memory_space<vmem>>, %arg6: memref<8x128xf32, #tpu.memory_space<vmem>>) attributes {dimension_semantics = [#tpu.dimension_semantics<parallel>], iteration_bounds = array<i64: 1>, scalar_prefetch = 0 : i64, scratch_operands = 0 : i64, tpu.core_type = #tpu.core_type<tc>, window_params = [{transform_indices = @transform_0, window_bounds = array<i64: 8, 1792>}, {pipeline_mode = #tpu.pipeline_mode<synchronous>, transform_indices = @transform_1, window_bounds = array<i64: 1792, 128>}, {pipeline_mode = #tpu.pipeline_mode<synchronous>, transform_indices = @transform_2, window_bounds = array<i64: 1, 128>}, {pipeline_mode = #tpu.pipeline_mode<synchronous>, transform_indices = @transform_3, window_bounds = array<i64: 1, 128>}, {pipeline_mode = #tpu.pipeline_mode<synchronous>, transform_indices = @transform_4, window_bounds = array<i64: 1, 128>}, {transform_indices = @transform_5, window_bounds = array<i64: 8, 128>}]} {
    %c0 = arith.constant 0 : index
    %c0_0 = arith.constant 0 : index
    %0 = vector.load %arg1[%c0, %c0_0] : memref<8x1792xbf16, #tpu.memory_space<vmem>>, vector<8x1792xbf16>
    %c0_1 = arith.constant 0 : index
    %c0_2 = arith.constant 0 : index
    %1 = vector.load %arg2[%c0_1, %c0_2] : memref<1792x128xbf16, #tpu.memory_space<vmem>>, vector<1792x128xbf16>
    %cst = arith.constant dense<0.000000e+00> : vector<8x128xf32>
    %2 = tpu.matmul %0, %1, %cst {dimension_numbers = #tpu.dot_dimension_numbers<[1], [0], [0], [1], [0, 0, 1, 1], [], []>} : vector<8x1792xbf16>, vector<1792x128xbf16>, vector<8x128xf32> -> vector<8x128xf32>
    %c0_3 = arith.constant 0 : index
    %c0_4 = arith.constant 0 : index
    %3 = vector.load %arg3[%c0_3, %c0_4] : memref<1x128xf32, #tpu.memory_space<vmem>>, vector<1x128xf32>
    %4 = vector.broadcast %3 : vector<1x128xf32> to vector<8x128xf32>
    %5 = arith.addf %2, %4 : vector<8x128xf32>
    %cst_5 = arith.constant dense<0.000000e+00> : vector<8xf32>
    %6 = vector.multi_reduction <add>, %5, %cst_5 [1] : vector<8x128xf32> to vector<8xf32>
    %7 = vector.shape_cast %6 : vector<8xf32> to vector<8x1xf32>
    %cst_6 = arith.constant 1.280000e+02 : f32
    %8 = vector.broadcast %cst_6 : f32 to vector<8x1xf32>
    %9 = arith.divf %7, %8 : vector<8x1xf32>
    %10 = vector.broadcast %9 : vector<8x1xf32> to vector<8x128xf32>
    %11 = arith.subf %5, %10 : vector<8x128xf32>
    %12 = arith.mulf %11, %11 : vector<8x128xf32>
    %cst_7 = arith.constant dense<0.000000e+00> : vector<8xf32>
    %13 = vector.multi_reduction <add>, %12, %cst_7 [1] : vector<8x128xf32> to vector<8xf32>
    %14 = vector.shape_cast %13 : vector<8xf32> to vector<8x1xf32>
    %cst_8 = arith.constant 1.280000e+02 : f32
    %15 = vector.broadcast %cst_8 : f32 to vector<8x1xf32>
    %16 = arith.divf %14, %15 : vector<8x1xf32>
    %17 = vector.broadcast %9 : vector<8x1xf32> to vector<8x128xf32>
    %18 = arith.subf %5, %17 : vector<8x128xf32>
    %cst_9 = arith.constant 9.99999974E-6 : f32
    %19 = vector.broadcast %cst_9 : f32 to vector<8x1xf32>
    %20 = arith.addf %16, %19 : vector<8x1xf32>
    %21 = math.rsqrt %20 : vector<8x1xf32>
    %22 = vector.broadcast %21 : vector<8x1xf32> to vector<8x128xf32>
    %23 = arith.mulf %18, %22 : vector<8x128xf32>
    %c0_10 = arith.constant 0 : index
    %c0_11 = arith.constant 0 : index
    %24 = vector.load %arg4[%c0_10, %c0_11] : memref<1x128xf32, #tpu.memory_space<vmem>>, vector<1x128xf32>
    %25 = vector.broadcast %24 : vector<1x128xf32> to vector<8x128xf32>
    %26 = arith.mulf %23, %25 : vector<8x128xf32>
    %c0_12 = arith.constant 0 : index
    %c0_13 = arith.constant 0 : index
    %27 = vector.load %arg5[%c0_12, %c0_13] : memref<1x128xf32, #tpu.memory_space<vmem>>, vector<1x128xf32>
    %28 = vector.broadcast %27 : vector<1x128xf32> to vector<8x128xf32>
    %29 = arith.addf %26, %28 : vector<8x128xf32>
    %c0_14 = arith.constant 0 : index
    %c0_15 = arith.constant 0 : index
    %30 = vector.load %arg6[%c0_14, %c0_15] : memref<8x128xf32, #tpu.memory_space<vmem>>, vector<8x128xf32>
    tpu.vector_store %arg6[%c0_14, %c0_15], %29 {strides = array<i32>} : memref<8x128xf32, #tpu.memory_space<vmem>>, vector<8x128xf32>,
    return
  }
  func.func @transform_0(%arg0: i32) -> (i32, i32) {
    %c0_i32 = arith.constant 0 : i32
    %c0_i32_0 = arith.constant 0 : i32
    return %arg0, %c0_i32 : i32, i32
  }
  func.func @transform_1(%arg0: i32) -> (i32, i32) {
    %c0_i32 = arith.constant 0 : i32
    %c0_i32_0 = arith.constant 0 : i32
    %c0_i32_1 = arith.constant 0 : i32
    return %c0_i32, %c0_i32_0 : i32, i32
  }
  func.func @transform_2(%arg0: i32) -> (i32, i32) {
    %c0_i32 = arith.constant 0 : i32
    %c0_i32_0 = arith.constant 0 : i32
    %c0_i32_1 = arith.constant 0 : i32
    return %c0_i32, %c0_i32_0 : i32, i32
  }
  func.func @transform_3(%arg0: i32) -> (i32, i32) {
    %c0_i32 = arith.constant 0 : i32
    %c0_i32_0 = arith.constant 0 : i32
    %c0_i32_1 = arith.constant 0 : i32
    return %c0_i32, %c0_i32_0 : i32, i32
  }
  func.func @transform_4(%arg0: i32) -> (i32, i32) {
    %c0_i32 = arith.constant 0 : i32
    %c0_i32_0 = arith.constant 0 : i32
    %c0_i32_1 = arith.constant 0 : i32
    return %c0_i32, %c0_i32_0 : i32, i32
  }
  func.func @transform_5(%arg0: i32) -> (i32, i32) {
    %c0_i32 = arith.constant 0 : i32
    %c0_i32_0 = arith.constant 0 : i32
    return %arg0, %c0_i32 : i32, i32
  }
}

</mosaic_0001>

<bundles_post_ra>
// kernel: tpu_custom_call.1
= control target key start
LH: loop header
LB: loop body
LE: loop exit
PB: predicated region body
PF: predicated region fallthrough
CT: control target
= control target key end

     0   :  { %10 = vsyncpa [#allocation3], 0  ;;  %s1907_s0 = inlined_call_operand.hbm [shape: bf16[8,1792], index: 0, kind: input, shape index: {}]   ;;  %s1908_s1 = inlined_call_operand.hbm [shape: bf16[1792,128], index: 1, kind: input, shape index: {}]   ;;  %s1909_s2 = inlined_call_operand.vmem [shape: f32[1,128], index: 2, kind: input, shape index: {}]   ;;  %s1910_s3 = inlined_call_operand.vmem [shape: f32[1,128], index: 3, kind: input, shape index: {}]   ;;  %s1911_s4 = inlined_call_operand.vmem [shape: f32[1,128], index: 4, kind: input, shape index: {}]   ;;  %s1912_s5 = inlined_call_operand.hbm [shape: f32[8,128], index: 5, kind: output, shape index: {}]  }
   0x1   :  { %11 = vsyncpa [#allocation6], 0 }
   0x2   :  { %12 = vsyncpa [#allocation4], 0  ;;  %s1820_s18 = smov [#allocation2]   ;;  %s1821_s20 = smov [#allocation5]  }
   0x3   :  { %s19_s19 = sshll.u32 %s1820_s18, 4  ;;  %s28_s21 = sshll.u32 %s1821_s20, 4  ;;  %s20_s19 = int_to_ptr.vmem [resolvable:$true] %s19_s19  ;;  %s1855_s21 = int_to_ptr.vmem [resolvable:$true] %s28_s21 }
   0x4   :  { %s1748_s24 = scalar_lea.hbm %s1907_s0, 896 }
   0x5   :  { %p1749_p0 = scmp.ne.s32.totalorder %s1907_s0, %s1748_s24  ;;  %p1752_p1 = scmp.lt.u32.totalorder %s1748_s24, %s1907_s0 }
   0x7   :  { %p1754_p2 = pnand %p1752_p1, %p1749_p0 }
   0x9   :  { %1757 = shalt.err (!%p1754_p2)
}
   0xa   :  { %s1758_s29 = scalar_lea.vmem %s20_s19, 896  ;;  %p1763_p4 = scmp.lt.s32.totalorder %s20_s19, %s20_s19 }
   0xb   :  { %p1759_p3 = scmp.ne.s32.totalorder %s20_s19, %s1758_s29  ;;  %p1764_p5 = scmp.lt.s32.totalorder %s1758_s29, %s1758_s29 }
   0xd   :  { %p1765_p6 = por %p1764_p5, %p1763_p4 }
   0xf   :  { %p1766_p7 = pnand %p1765_p6, %p1759_p3 }
  0x11   :  { %1769 = shalt.err (!%p1766_p7)
}
  0x12   :  { %22 = dma.hbm_to_vmem [thread:$0]  %s1907_s0, 896, %s20_s19, [#allocation3]  }
  0x13   :  { %s1770_s9 = scalar_lea.hbm %s1908_s1, 14336 }
  0x14   :  { %p1771_p8 = scmp.ne.s32.totalorder %s1908_s1, %s1770_s9  ;;  %p1774_p9 = scmp.lt.u32.totalorder %s1770_s9, %s1908_s1 }
  0x16   :  { %p1776_p10 = pnand %p1774_p9, %p1771_p8 }
  0x18   :  { %1779 = shalt.err (!%p1776_p10)
}
  0x19   :  { %s1780_s14 = scalar_lea.vmem %s1855_s21, 14336  ;;  %p1785_p12 = scmp.lt.s32.totalorder %s1855_s21, %s1855_s21 }
  0x1a   :  { %p1781_p11 = scmp.ne.s32.totalorder %s1855_s21, %s1780_s14  ;;  %p1786_p13 = scmp.lt.s32.totalorder %s1780_s14, %s1780_s14 }
  0x1c   :  { %p1787_p0 = por %p1786_p13, %p1785_p12 }
  0x1e   :  { %p1788_p1 = pnand %p1787_p0, %p1781_p11 }
  0x20   :  { %1791 = shalt.err (!%p1788_p1)
}
  0x21   :  { %s1822_s0 = smov 64   ;;  %s1823_s15 = smov 4  }
  0x22   :  { %34 = dma.hbm_to_vmem [thread:$0]  %s1908_s1, 14336, %s1855_s21, [#allocation6], %s1822_s0, %s1822_s0, %s1823_s15  }
  0x23   :  { %1814 = dma.done.wait [#allocation3], 896  }
  0x24   :  { %1815 = vsyncadd [#allocation3], 4294966400 }
  0x25   :  { %1816 = dma.done.wait [#allocation6], 14336  }
  0x26   :  { %1817 = vsyncadd [#allocation6], 4294952960  ;;  %v1620_v0 = vld [vmem:[#allocation5 + $0x40] sm:$0xff]   ;;  %v1624_v4 = vld [vmem:[#allocation5 + $0x48] sm:$0xff]   ;;  %s1824_s22 = smov [#allocation7]  }
  0x27   :  { %v1621_v1 = vld [vmem:[#allocation5] sm:$0xff]   ;;  %1461 = vmatprep.subr.bf16.mxu0 %v1620_v0  ;;  %v1625_v5 = vld [vmem:[#allocation5 + $0x8] sm:$0xff]   ;;  %v1628_v8 = vld [vmem:[#allocation5 + $0x50] sm:$0xff]   ;;  %s1322_s23 = sshll.u32 %s1824_s22, 4  ;;  %s1323_s23 = int_to_ptr.vmem [resolvable:$true] %s1322_s23 }
  0x28   :  { %v1622_v2 = vld [vmem:[#allocation5 + $0xc0] sm:$0xff]   ;;  %1462 = vmatpush3.bf16.msra.mxu0 %v1621_v1  ;;  %v1626_v6 = vld [vmem:[#allocation5 + $0xc8] sm:$0xff]   ;;  %v1629_v9 = vld [vmem:[#allocation5 + $0x10] sm:$0xff]   ;;  %s1792_s24 = scalar_lea.vmem %s1323_s23, 128  ;;  %p1797_p3 = scmp.lt.s32.totalorder %s1323_s23, %s1323_s23 }
  0x29   :  { %v1623_v3 = vld [vmem:[#allocation5 + $0x80] sm:$0xff]   ;;  %1483 = vmatprep.subr.bf16.mxu1 %v1622_v2  ;;  %1463 = vmatprep.subr.bf16.mxu0 %v1624_v4  ;;  %v1627_v7 = vld [vmem:[#allocation5 + $0x88] sm:$0xff]   ;;  %v1630_v10 = vld [vmem:[#allocation5 + $0xd0] sm:$0xff]   ;;  %p1793_p2 = scmp.ne.s32.totalorder %s1323_s23, %s1792_s24  ;;  %p1798_p4 = scmp.lt.s32.totalorder %s1792_s24, %s1792_s24 }
  0x2a   :  { %1484 = vmatpush3.bf16.msra.mxu1 %v1623_v3  ;;  %v1631_v11 = vld [vmem:[#allocation5 + $0x90] sm:$0xff]   ;;  %v1632_v12 = vld [vmem:[#allocation5 + $0x58] sm:$0xff]   ;;  %v1636_v16 = vld [vmem:[#allocation5 + $0x60] sm:$0xff]  }
  0x2b   :  { %1485 = vmatprep.subr.bf16.mxu1 %v1626_v6  ;;  %v1633_v13 = vld [vmem:[#allocation5 + $0x18] sm:$0xff]   ;;  %v1637_v17 = vld [vmem:[#allocation5 + $0x20] sm:$0xff]   ;;  %v1640_v20 = vld [vmem:[#allocation5 + $0x68] sm:$0xff]   ;;  %p1799_p5 = por %p1798_p4, %p1797_p3 }
  0x2c   :  { %1464 = vmatpush3.bf16.msra.mxu0 %v1625_v5  ;;  %v1634_v14 = vld [vmem:[#allocation5 + $0xd8] sm:$0xff]   ;;  %v1638_v18 = vld [vmem:[#allocation5 + $0xe0] sm:$0xff]   ;;  %v1641_v21 = vld [vmem:[#allocation5 + $0x28] sm:$0xff]  }
  0x2d   :  { %1465 = vmatprep.subr.bf16.mxu0 %v1628_v8  ;;  %v1635_v15 = vld [vmem:[#allocation5 + $0x98] sm:$0xff]   ;;  %v1639_v19 = vld [vmem:[#allocation5 + $0xa0] sm:$0xff]   ;;  %v1642_v22 = vld [vmem:[#allocation5 + $0xe8] sm:$0xff]   ;;  %p1800_p6 = pnand %p1799_p5, %p1793_p2 }
  0x2e   :  { %1486 = vmatpush3.bf16.msra.mxu1 %v1627_v7  ;;  %v1643_v23 = vld [vmem:[#allocation5 + $0xa8] sm:$0xff]   ;;  %v1644_v24 = vld [vmem:[#allocation5 + $0x70] sm:$0xff]   ;;  %v1648_v28 = vld [vmem:[#allocation5 + $0x78] sm:$0xff]  }
  0x2f   :  { %1487 = vmatprep.subr.bf16.mxu1 %v1630_v10  ;;  %v1645_v25 = vld [vmem:[#allocation5 + $0x30] sm:$0xff]   ;;  %v1649_v29 = vld [vmem:[#allocation5 + $0x38] sm:$0xff]   ;;  %v48_v31 = vld [vmem:[#allocation2] sm:$0xff] }
  0x30   :  { %1466 = vmatpush3.bf16.msra.mxu0 %v1629_v9  ;;  %v1646_v26 = vld [vmem:[#allocation5 + $0xf0] sm:$0xff]   ;;  %v1650_v30 = vld [vmem:[#allocation5 + $0xf8] sm:$0xff]   ;;  %v1333_v32 = vcombine.low %v48_v31, %v48_v31  ;;  %v1334_v33 = vcombine.high %v48_v31, %v48_v31  ;;  %v1654_v35 = vld [vmem:[#allocation5 + $0x140] sm:$0xff]  }
  0x31   :  { %1467 = vmatprep.subr.bf16.mxu0 %v1632_v12  ;;  %v1647_v27 = vld [vmem:[#allocation5 + $0xb0] sm:$0xff]   ;;  %v1653_v34 = vld [vmem:[#allocation5 + $0xb8] sm:$0xff]   ;;  %v1657_v39 = vld [vmem:[#allocation5 + $0x100] sm:$0xff]  }
  0x32   :  { %1488 = vmatpush3.bf16.msra.mxu1 %v1631_v11  ;;  %v49_v36 = vld [vmem:[#allocation2 + $0x8] sm:$0xff]  ;;  %1039 = vmatprep.mubr.bf16.mxu0 %v1334_v33  ;;  %v1658_v40 = vld [vmem:[#allocation5 + $0x1c0] sm:$0xff]   ;;  %v1660_v42 = vld [vmem:[#allocation5 + $0x148] sm:$0xff]  }
  0x33   :  { %1489 = vmatprep.subr.bf16.mxu1 %v1634_v14  ;;  %v1335_v37 = vcombine.low %v49_v36, %v49_v36  ;;  %v1336_v38 = vcombine.high %v49_v36, %v49_v36  ;;  %v1659_v41 = vld [vmem:[#allocation5 + $0x180] sm:$0xff]   ;;  %v1661_v43 = vld [vmem:[#allocation5 + $0x108] sm:$0xff]   ;;  %v1664_v46 = vld [vmem:[#allocation5 + $0x150] sm:$0xff]  }
  0x34   :  { %1468 = vmatpush3.bf16.msra.mxu0 %v1633_v13  ;;  %v1662_v44 = vld [vmem:[#allocation5 + $0x1c8] sm:$0xff]   ;;  %v1665_v47 = vld [vmem:[#allocation5 + $0x110] sm:$0xff]   ;;  %v1668_v50 = vld [vmem:[#allocation5 + $0x158] sm:$0xff]  }
  0x35   :  { %1469 = vmatprep.subr.bf16.mxu0 %v1636_v16  ;;  %1079 = vmatprep.mubr.bf16.mxu1 %v1336_v38  ;;  %v1663_v45 = vld [vmem:[#allocation5 + $0x188] sm:$0xff]   ;;  %v1666_v48 = vld [vmem:[#allocation5 + $0x1d0] sm:$0xff]   ;;  %v1669_v51 = vld [vmem:[#allocation5 + $0x118] sm:$0xff]  }
  0x36   :  { %1490 = vmatpush3.bf16.msra.mxu1 %v1635_v15  ;;  %v1667_v49 = vld [vmem:[#allocation5 + $0x190] sm:$0xff]   ;;  %v1670_v52 = vld [vmem:[#allocation5 + $0x1d8] sm:$0xff]   ;;  %v1672_v54 = vld [vmem:[#allocation5 + $0x160] sm:$0xff]  }
  0x37   :  { %1491 = vmatprep.subr.bf16.mxu1 %v1638_v18  ;;  %v1671_v53 = vld [vmem:[#allocation5 + $0x198] sm:$0xff]   ;;  %v1673_v55 = vld [vmem:[#allocation5 + $0x120] sm:$0xff]   ;;  %v1676_v58 = vld [vmem:[#allocation5 + $0x168] sm:$0xff]  }
  0x38   :  { %1470 = vmatpush3.bf16.msra.mxu0 %v1637_v17  ;;  %v1674_v56 = vld [vmem:[#allocation5 + $0x1e0] sm:$0xff]   ;;  %v1677_v59 = vld [vmem:[#allocation5 + $0x128] sm:$0xff]   ;;  %v1680_v62 = vld [vmem:[#allocation5 + $0x170] sm:$0xff]  }
  0x39   :  { %1471 = vmatprep.subr.bf16.mxu0 %v1640_v20  ;;  %v1675_v57 = vld [vmem:[#allocation5 + $0x1a0] sm:$0xff]   ;;  %v1678_v60 = vld [vmem:[#allocation5 + $0x1e8] sm:$0xff]   ;;  %v1681_v63 = vld [vmem:[#allocation5 + $0x130] sm:$0xff]  }
  0x3a   :  { %1492 = vmatpush3.bf16.msra.mxu1 %v1639_v19  ;;  %v1679_v61 = vld [vmem:[#allocation5 + $0x1a8] sm:$0xff]   ;;  %v1682_v0 = vld [vmem:[#allocation5 + $0x1f0] sm:$0xff]   ;;  %v1684_v2 = vld [vmem:[#allocation5 + $0x178] sm:$0xff]  }
  0x3b   :  { %1493 = vmatprep.subr.bf16.mxu1 %v1642_v22  ;;  %v1683_v1 = vld [vmem:[#allocation5 + $0x1b0] sm:$0xff]   ;;  %v1685_v3 = vld [vmem:[#allocation5 + $0x138] sm:$0xff]   ;;  %v1690_v9 = vld [vmem:[#allocation5 + $0x240] sm:$0xff]  }
  0x3c   :  { %1472 = vmatpush3.bf16.msra.mxu0 %v1641_v21  ;;  %v1686_v4 = vld [vmem:[#allocation5 + $0x1f8] sm:$0xff]   ;;  %v51_v10 = vld [vmem:[#allocation2 + $0x18] sm:$0xff]  ;;  %v1696_v16 = vld [vmem:[#allocation5 + $0x248] sm:$0xff]  }
  0x3d   :  { %1473 = vmatprep.subr.bf16.mxu0 %v1644_v24  ;;  %v50_v5 = vld [vmem:[#allocation2 + $0x10] sm:$0xff]  ;;  %v1339_v11 = vcombine.low %v51_v10, %v51_v10  ;;  %v1340_v12 = vcombine.high %v51_v10, %v51_v10  ;;  %v1693_v13 = vld [vmem:[#allocation5 + $0x200] sm:$0xff]   ;;  %v1697_v17 = vld [vmem:[#allocation5 + $0x208] sm:$0xff]  }
  0x3e   :  { %1494 = vmatpush3.bf16.msra.mxu1 %v1643_v23  ;;  %v1337_v6 = vcombine.low %v50_v5, %v50_v5  ;;  %v1338_v7 = vcombine.high %v50_v5, %v50_v5  ;;  %v1689_v8 = vld [vmem:[#allocation5 + $0x1b8] sm:$0xff]   ;;  %v1694_v14 = vld [vmem:[#allocation5 + $0x2c0] sm:$0xff]   ;;  %v1698_v18 = vld [vmem:[#allocation5 + $0x2c8] sm:$0xff]  }
  0x3f   :  { %1495 = vmatprep.subr.bf16.mxu1 %v1646_v26  ;;  %v1695_v15 = vld [vmem:[#allocation5 + $0x280] sm:$0xff]   ;;  %v1699_v19 = vld [vmem:[#allocation5 + $0x288] sm:$0xff]   ;;  %v1700_v20 = vld [vmem:[#allocation5 + $0x250] sm:$0xff]  }
  0x40   :  { %1474 = vmatpush3.bf16.msra.mxu0 %v1645_v25  ;;  %v1701_v21 = vld [vmem:[#allocation5 + $0x210] sm:$0xff]   ;;  %v1704_v24 = vld [vmem:[#allocation5 + $0x258] sm:$0xff]   ;;  %v1711_v31 = vld [vmem:[#allocation5 + $0x2a0] sm:$0xff]  }
  0x41   :  { %1475 = vmatprep.subr.bf16.mxu0 %v1648_v28  ;;  %v1702_v22 = vld [vmem:[#allocation5 + $0x2d0] sm:$0xff]   ;;  %v1705_v25 = vld [vmem:[#allocation5 + $0x218] sm:$0xff]   ;;  %v1708_v28 = vld [vmem:[#allocation5 + $0x260] sm:$0xff]  }
  0x42   :  { %1496 = vmatpush3.bf16.msra.mxu1 %v1647_v27  ;;  %v1703_v23 = vld [vmem:[#allocation5 + $0x290] sm:$0xff]   ;;  %v1706_v26 = vld [vmem:[#allocation5 + $0x2d8] sm:$0xff]   ;;  %v1713_v33 = vld [vmem:[#allocation5 + $0x228] sm:$0xff]  }
  0x43   :  { %1497 = vmatprep.subr.bf16.mxu1 %v1650_v30  ;;  %v1707_v27 = vld [vmem:[#allocation5 + $0x298] sm:$0xff]   ;;  %v1710_v30 = vld [vmem:[#allocation5 + $0x2e0] sm:$0xff]   ;;  %v1716_v36 = vld [vmem:[#allocation5 + $0x270] sm:$0xff]  }
  0x44   :  { %1476 = vmatpush3.bf16.msra.mxu0 %v1649_v29  ;;  %v1709_v29 = vld [vmem:[#allocation5 + $0x220] sm:$0xff]   ;;  %v1718_v38 = vld [vmem:[#allocation5 + $0x2f0] sm:$0xff]  }
  0x45   :  { %1505 = vmatprep.subr.bf16.mxu0 %v1654_v35  ;;  %v1715_v35 = vld [vmem:[#allocation5 + $0x2a8] sm:$0xff]  }
  0x46   :  { %1498 = vmatpush3.bf16.msra.mxu1 %v1653_v34  ;;  %v1714_v34 = vld [vmem:[#allocation5 + $0x2e8] sm:$0xff]  }
  0x47   :  { %1040 = vmatmul.mubr.bf16.vlgmr.msra.gmra.mrb[0].mxu0 %v1333_v32  ;;  %1527 = vmatprep.subr.bf16.mxu1 %v1658_v40  ;;  %v1712_v32 = vld [vmem:[#allocation5 + $0x268] sm:$0xff]   ;;  %v1720_v40 = vld [vmem:[#allocation5 + $0x278] sm:$0xff]  }
  0x48   :  { %1506 = vmatpush3.bf16.msra.mxu0 %v1657_v39  ;;  %1119 = vmatprep.mubr.bf16.mxu0 %v1338_v7  ;;  %v1719_v39 = vld [vmem:[#allocation5 + $0x2b0] sm:$0xff]  }
  0x49   :  { %1080 = vmatmul.mubr.bf16.vlgmr.msra.gmra.mrb[0].mxu1 %v1335_v37  ;;  %1507 = vmatprep.subr.bf16.mxu0 %v1660_v42  ;;  %v1717_v37 = vld [vmem:[#allocation5 + $0x230] sm:$0xff]   ;;  %v1722_v42 = vld [vmem:[#allocation5 + $0x2f8] sm:$0xff]  }
  0x4a   :  { %1528 = vmatpush3.bf16.msra.mxu1 %v1659_v41  ;;  %1159 = vmatprep.mubr.bf16.mxu1 %v1340_v12  ;;  %v1721_v41 = vld [vmem:[#allocation5 + $0x238] sm:$0xff]  }
  0x4b   :  { %1529 = vmatprep.subr.bf16.mxu1 %v1662_v44 }
  0x4c   :  { %1508 = vmatpush3.bf16.msra.mxu0 %v1661_v43  ;;  %v52_v43 = vld [vmem:[#allocation2 + $0x20] sm:$0xff] }
  0x4d   :  { %1509 = vmatprep.subr.bf16.mxu0 %v1664_v46  ;;  %v1341_v44 = vcombine.low %v52_v43, %v52_v43  ;;  %v1725_v46 = vld [vmem:[#allocation5 + $0x2b8] sm:$0xff]  }
  0x4e   :  { %1530 = vmatpush3.bf16.msra.mxu1 %v1663_v45  ;;  %v1342_v45 = vcombine.high %v52_v43, %v52_v43 }
  0x4f   :  { %1531 = vmatprep.subr.bf16.mxu1 %v1666_v48  ;;  %v53_v48 = vld [vmem:[#allocation2 + $0x28] sm:$0xff] }
  0x50   :  { %1510 = vmatpush3.bf16.msra.mxu0 %v1665_v47  ;;  %v1726_v47 = vld [vmem:[#allocation5 + $0x340] sm:$0xff]  }
  0x51   :  { %1511 = vmatprep.subr.bf16.mxu0 %v1668_v50  ;;  %v1344_v50 = vcombine.high %v53_v48, %v53_v48 }
  0x52   :  { %1532 = vmatpush3.bf16.msra.mxu1 %v1667_v49  ;;  %v1343_v49 = vcombine.low %v53_v48, %v53_v48 }
  0x53   :  { %1533 = vmatprep.subr.bf16.mxu1 %v1670_v52  ;;  %v1730_v52 = vld [vmem:[#allocation5 + $0x348] sm:$0xff]  }
  0x54   :  { %1512 = vmatpush3.bf16.msra.mxu0 %v1669_v51  ;;  %v1729_v51 = vld [vmem:[#allocation5 + $0x300] sm:$0xff]  }
  0x55   :  { %1513 = vmatprep.subr.bf16.mxu0 %v1672_v54  ;;  %v1732_v54 = vld [vmem:[#allocation5 + $0x350] sm:$0xff]  }
  0x56   :  { %1534 = vmatpush3.bf16.msra.mxu1 %v1671_v53  ;;  %v1731_v53 = vld [vmem:[#allocation5 + $0x308] sm:$0xff]  }
  0x57   :  { %1535 = vmatprep.subr.bf16.mxu1 %v1674_v56  ;;  %v1734_v56 = vld [vmem:[#allocation5 + $0x358] sm:$0xff]  }
  0x58   :  { %1514 = vmatpush3.bf16.msra.mxu0 %v1673_v55  ;;  %v1733_v55 = vld [vmem:[#allocation5 + $0x310] sm:$0xff]  }
  0x59   :  { %1515 = vmatprep.subr.bf16.mxu0 %v1676_v58  ;;  %v1736_v58 = vld [vmem:[#allocation5 + $0x360] sm:$0xff]  }
  0x5a   :  { %1536 = vmatpush3.bf16.msra.mxu1 %v1675_v57  ;;  %v1735_v57 = vld [vmem:[#allocation5 + $0x318] sm:$0xff]  }
  0x5b   :  { %1537 = vmatprep.subr.bf16.mxu1 %v1678_v60  ;;  %v1738_v60 = vld [vmem:[#allocation5 + $0x368] sm:$0xff]  }
  0x5c   :  { %1516 = vmatpush3.bf16.msra.mxu0 %v1677_v59  ;;  %v1737_v59 = vld [vmem:[#allocation5 + $0x320] sm:$0xff]  }
  0x5d   :  { %1517 = vmatprep.subr.bf16.mxu0 %v1680_v62 }
  0x5e   :  { %1538 = vmatpush3.bf16.msra.mxu1 %v1679_v61  ;;  %v54_v61 = vld [vmem:[#allocation2 + $0x30] sm:$0xff] }
  0x5f   :  { %1539 = vmatprep.subr.bf16.mxu1 %v1682_v0  ;;  %v1346_v62 = vcombine.high %v54_v61, %v54_v61  ;;  %v1740_v0 = vld [vmem:[#allocation5 + $0x370] sm:$0xff]  }
  0x60   :  { %1518 = vmatpush3.bf16.msra.mxu0 %v1681_v63  ;;  %v1739_v63 = vld [vmem:[#allocation5 + $0x328] sm:$0xff]  }
  0x61   :  { %1519 = vmatprep.subr.bf16.mxu0 %v1684_v2  ;;  %v1742_v2 = vld [vmem:[#allocation5 + $0x378] sm:$0xff]  }
  0x62   :  { %1540 = vmatpush3.bf16.msra.mxu1 %v1683_v1  ;;  %v1741_v1 = vld [vmem:[#allocation5 + $0x330] sm:$0xff]  }
  0x63   :  { %1541 = vmatprep.subr.bf16.mxu1 %v1686_v4  ;;  %v1345_v4 = vcombine.low %v54_v61, %v54_v61 }
  0x64   :  { %1520 = vmatpush3.bf16.msra.mxu0 %v1685_v3  ;;  %v1743_v3 = vld [vmem:[#allocation5 + $0x338] sm:$0xff]  }
  0x65   :  { %1549 = vmatprep.subr.bf16.mxu0 %v1690_v9 }
  0x66   :  { %1542 = vmatpush3.bf16.msra.mxu1 %v1689_v8 }
  0x67   :  { %1120 = vmatmul.mubr.bf16.vlgmr.msra.gmra.mrb[4].mxu0 %v1337_v6  ;;  %1571 = vmatprep.subr.bf16.mxu1 %v1694_v14  ;;  %v1332_v6 = vld [vmem:[%s1909_s2] ss:$0 sm:$0xff] }
  0x68   :  { %1550 = vmatpush3.bf16.msra.mxu0 %v1693_v13  ;;  %1199 = vmatprep.mubr.bf16.mxu0 %v1342_v45 }
  0x69   :  { %1160 = vmatmul.mubr.bf16.vlgmr.msra.gmra.mrb[4].mxu1 %v1339_v11  ;;  %1551 = vmatprep.subr.bf16.mxu0 %v1696_v16 }
  0x6a   :  { %1572 = vmatpush3.bf16.msra.mxu1 %v1695_v15  ;;  %1239 = vmatprep.mubr.bf16.mxu1 %v1344_v50 }
  0x6b   :  { %1573 = vmatprep.subr.bf16.mxu1 %v1698_v18 }
  0x6c   :  { %1552 = vmatpush3.bf16.msra.mxu0 %v1697_v17 }
  0x6d   :  { %1553 = vmatprep.subr.bf16.mxu0 %v1700_v20 }
  0x6e   :  { %1574 = vmatpush3.bf16.msra.mxu1 %v1699_v19 }
  0x6f   :  { %1575 = vmatprep.subr.bf16.mxu1 %v1702_v22 }
  0x70   :  { %1554 = vmatpush3.bf16.msra.mxu0 %v1701_v21 }
  0x71   :  { %1555 = vmatprep.subr.bf16.mxu0 %v1704_v24 }
  0x72   :  { %1576 = vmatpush3.bf16.msra.mxu1 %v1703_v23 }
  0x73   :  { %1577 = vmatprep.subr.bf16.mxu1 %v1706_v26 }
  0x74   :  { %1556 = vmatpush3.bf16.msra.mxu0 %v1705_v25 }
  0x75   :  { %1557 = vmatprep.subr.bf16.mxu0 %v1708_v28 }
  0x76   :  { %1578 = vmatpush3.bf16.msra.mxu1 %v1707_v27 }
  0x77   :  { %1579 = vmatprep.subr.bf16.mxu1 %v1710_v30 }
  0x78   :  { %1558 = vmatpush3.bf16.msra.mxu0 %v1709_v29 }
  0x79   :  { %1559 = vmatprep.subr.bf16.mxu0 %v1712_v32 }
  0x7a   :  { %1580 = vmatpush3.bf16.msra.mxu1 %v1711_v31 }
  0x7b   :  { %1581 = vmatprep.subr.bf16.mxu1 %v1714_v34 }
  0x7c   :  { %1560 = vmatpush3.bf16.msra.mxu0 %v1713_v33 }
  0x7d   :  { %1561 = vmatprep.subr.bf16.mxu0 %v1716_v36 }
  0x7e   :  { %1582 = vmatpush3.bf16.msra.mxu1 %v1715_v35 }
  0x7f   :  { %1583 = vmatprep.subr.bf16.mxu1 %v1718_v38 }
  0x80   :  { %1562 = vmatpush3.bf16.msra.mxu0 %v1717_v37 }
  0x81   :  { %1563 = vmatprep.subr.bf16.mxu0 %v1720_v40 }
  0x82   :  { %1584 = vmatpush3.bf16.msra.mxu1 %v1719_v39 }
  0x83   :  { %1585 = vmatprep.subr.bf16.mxu1 %v1722_v42 }
  0x84   :  { %1564 = vmatpush3.bf16.msra.mxu0 %v1721_v41 }
  0x85   :  { %1593 = vmatprep.subr.bf16.mxu0 %v1726_v47 }
  0x86   :  { %1586 = vmatpush3.bf16.msra.mxu1 %v1725_v46 }
  0x87   :  { %1200 = vmatmul.mubr.bf16.vlgmr.msra.gmra.mrb[8].mxu0 %v1341_v44 }
  0x88   :  { %1594 = vmatpush3.bf16.msra.mxu0 %v1729_v51  ;;  %1279 = vmatprep.mubr.bf16.mxu0 %v1346_v62 }
  0x89   :  { %1240 = vmatmul.mubr.bf16.vlgmr.msra.gmra.mrb[8].mxu1 %v1343_v49  ;;  %1595 = vmatprep.subr.bf16.mxu0 %v1730_v52 }
  0x8c   :  { %1596 = vmatpush3.bf16.msra.mxu0 %v1731_v53 }
  0x8d   :  { %1597 = vmatprep.subr.bf16.mxu0 %v1732_v54 }
  0x90   :  { %1598 = vmatpush3.bf16.msra.mxu0 %v1733_v55 }
  0x91   :  { %1599 = vmatprep.subr.bf16.mxu0 %v1734_v56  ;;  %v1459_v56 = vld [vmem:[%s1910_s3] ss:$0 sm:$0xff] }
  0x94   :  { %1600 = vmatpush3.bf16.msra.mxu0 %v1735_v57 }
  0x95   :  { %1601 = vmatprep.subr.bf16.mxu0 %v1736_v58  ;;  %v1460_v58 = vld [vmem:[%s1911_s4] ss:$0 sm:$0xff] }
  0x98   :  { %1602 = vmatpush3.bf16.msra.mxu0 %v1737_v59 }
  0x99   :  { %1603 = vmatprep.subr.bf16.mxu0 %v1738_v60 }
  0x9c   :  { %1604 = vmatpush3.bf16.msra.mxu0 %v1739_v63 }
  0x9d   :  { %1605 = vmatprep.subr.bf16.mxu0 %v1740_v0 }
  0xa0   :  { %1606 = vmatpush3.bf16.msra.mxu0 %v1741_v1 }
  0xa1   :  { %1607 = vmatprep.subr.bf16.mxu0 %v1742_v2 }
  0xa4   :  { %1608 = vmatpush3.bf16.msra.mxu0 %v1743_v3 }
  0xa7   :  { %1280 = vmatmul.mubr.bf16.vlgmr.msra.gmra.mrb[12].mxu0 %v1345_v4 }
 0x11a   :  { %v1477_v5 = vpop.f32.mrb[0].mxu0 }
 0x11b   :  { %v1478_v7 = vpop.f32.mrb[1].mxu0 }
 0x11c   :  { %v1479_v8 = vadd.f32 %v1478_v7, %v1477_v5  ;;  %v1480_v9 = vpop.f32.mrb[2].mxu0  ;;  %v1499_v10 = vpop.f32.mrb[0].mxu1 }
 0x11d   :  { %v1481_v11 = vpop.f32.mrb[3].mxu0  ;;  %v1500_v12 = vpop.f32.mrb[1].mxu1 }
 0x11e   :  { %v1042_v13 = vadd.f32 %v1479_v8, %v1332_v6  ;;  %v1501_v14 = vadd.f32 %v1500_v12, %v1499_v10  ;;  %v1502_v15 = vpop.f32.mrb[2].mxu1 }
 0x11f   :  { %v1503_v16 = vpop.f32.mrb[3].mxu1 }
 0x120   :  { %v1082_v17 = vadd.f32 %v1501_v14, %v1042_v13 }
 0x13a   :  { %v1521_v18 = vpop.f32.mrb[4].mxu0 }
 0x13b   :  { %v1522_v19 = vpop.f32.mrb[5].mxu0 }
 0x13c   :  { %v1523_v20 = vadd.f32 %v1522_v19, %v1521_v18  ;;  %v1524_v21 = vpop.f32.mrb[6].mxu0  ;;  %v1543_v22 = vpop.f32.mrb[4].mxu1 }
 0x13d   :  { %v1525_v23 = vpop.f32.mrb[7].mxu0  ;;  %v1544_v25 = vpop.f32.mrb[5].mxu1 }
 0x13e   :  { %v1122_v24 = vadd.f32 %v1523_v20, %v1082_v17  ;;  %v1545_v26 = vadd.f32 %v1544_v25, %v1543_v22  ;;  %v1546_v27 = vpop.f32.mrb[6].mxu1 }
 0x13f   :  { %v1547_v28 = vpop.f32.mrb[7].mxu1 }
 0x140   :  { %v1162_v29 = vadd.f32 %v1545_v26, %v1122_v24 }
 0x15a   :  { %v1565_v30 = vpop.f32.mrb[8].mxu0 }
 0x15b   :  { %v1566_v31 = vpop.f32.mrb[9].mxu0 }
 0x15c   :  { %v1567_v32 = vadd.f32 %v1566_v31, %v1565_v30  ;;  %v1568_v33 = vpop.f32.mrb[10].mxu0  ;;  %v1587_v34 = vpop.f32.mrb[8].mxu1 }
 0x15d   :  { %v1569_v35 = vpop.f32.mrb[11].mxu0  ;;  %v1588_v36 = vpop.f32.mrb[9].mxu1 }
 0x15e   :  { %v1202_v37 = vadd.f32 %v1567_v32, %v1162_v29  ;;  %v1589_v38 = vadd.f32 %v1588_v36, %v1587_v34  ;;  %v1590_v39 = vpop.f32.mrb[10].mxu1 }
 0x15f   :  { %v1591_v40 = vpop.f32.mrb[11].mxu1 }
 0x160   :  { %v1242_v41 = vadd.f32 %v1589_v38, %v1202_v37 }
 0x17a   :  { %v1609_v42 = vpop.f32.mrb[12].mxu0 }
 0x17b   :  { %v1610_v43 = vpop.f32.mrb[13].mxu0 }
 0x17c   :  { %v1611_v44 = vadd.f32 %v1610_v43, %v1609_v42  ;;  %v1612_v45 = vpop.f32.mrb[14].mxu0 }
 0x17d   :  { %v1613_v46 = vpop.f32.mrb[15].mxu0 }
 0x17e   :  { %v1282_v47 = vadd.f32 %v1611_v44, %v1242_v41 }
 0x180   :  { %1287 = vadd.xlane.f32.xlu0 %v1282_v47 }
 0x20d   :  { %v1288_v48 = vpop.xlane.xlu0 %1287 }
 0x20e   :  { %v1290_v49 = vmul.f32 0.0078125, %v1288_v48 }
 0x210   :  { %v1291_v50 = vsub.f32 %v1282_v47, %v1290_v49 }
 0x212   :  { %v1292_v51 = vmul.f32 %v1291_v50, %v1291_v50 }
 0x214   :  { %1293 = vadd.xlane.f32.xlu0 %v1292_v51 }
 0x2a1   :  { %v1294_v52 = vpop.xlane.xlu0 %1293 }
 0x2a2   :  { %v1295_v53 = vmul.f32 0.0078125, %v1294_v52 }
 0x2a4   :  { %v1296_v54 = vadd.f32 1e-05, %v1295_v53 }
 0x2a6   :  { %1746 = vrsqrt.f32 %v1296_v54 }
 0x2b0   :  { %v1747_v55 = vpop.eup %1746 }
 0x2b1   :  { %v1298_v57 = vmul.f32 %v1747_v55, %v1291_v50 }
 0x2b3   :  { %v1306_v59 = vmul.f32 %v1459_v56, %v1298_v57 }
 0x2b5   :  { %v1314_v60 = vadd.f32 %v1460_v58, %v1306_v59 }
 0x2b7   :  { %1315 = vst [vmem:[#allocation7] sm:$0xff] %v1314_v60 }
 0x2b8   :  { %1803 = shalt.err (!%p1800_p6)
}
 0x2b9   :  { %s1804_s26 = scalar_lea.hbm %s1912_s5, 128 }
 0x2ba   :  { %p1805_p7 = scmp.ne.s32.totalorder %s1912_s5, %s1804_s26  ;;  %p1808_p8 = scmp.lt.u32.totalorder %s1804_s26, %s1912_s5 }
 0x2bc   :  { %p1810_p9 = pnand %p1808_p8, %p1805_p7 }
 0x2be   :  { %1813 = shalt.err (!%p1810_p9)
}
 0x2bf   :  { %1325 = dma.vmem_to_hbm [thread:$0]  %s1323_s23, 128, %s1912_s5, [#allocation4]  }
 0x2c0   :  { %1818 = dma.done.wait [#allocation4], 128  }
 0x2c1   :  { %1819 = vsyncadd [#allocation4], 4294967168 }
 0x2c2   :  { %1329 = vsyncpa [#allocation3], 1 }
 0x2c3   :  { %1330 = vsyncpa [#allocation6], 1 }
 0x2c4   :  { %1331 = vsyncpa [#allocation4], 1 }

</bundles_post_ra>
